<compile_context>
chip_gen: v6e
topology: v6e:2x2x1
jax: 0.10.0
libtpu: 0.0.40
codegen_flags: <defaults>
</compile_context>

<pallas_src>
import functools
import math

import jax
import jax.numpy as jnp
from jax.experimental import pallas as pl
from jax.experimental.pallas import tpu as pltpu


def _time_shift(z, s):
    """Return r with r[:, t] = z[:, t - s] when 0 <= t - s < T, else 0 (s static int)."""
    nb, t_len = z.shape
    if s == 0:
        return z
    if t_len % 128 == 0:
        # Lane-aligned time axis: XLU lane rotate (no VMEM temporaries), then mask the
        # wrapped-around lanes at the edges.
        rolled = pltpu.roll(z, shift=s % t_len, axis=1)
        t_idx = jax.lax.broadcasted_iota(jnp.int32, z.shape, 1)
        return jnp.where((t_idx >= s) & (t_idx < t_len + s), rolled, 0.0)
    # Small / unaligned time axis (toy shapes): concat-of-slices, zeros already placed.
    zeros = jnp.zeros((nb, abs(s)), z.dtype)
    if s > 0:
        return jnp.concatenate([zeros, z[:, : t_len - s]], axis=1)
    return jnp.concatenate([z[:, -s:], zeros], axis=1)


def temporal_attention_kernel(x_ref, w_ref, o_ref, *, out_dim, kernel_size):
    # x_ref: (block_n, C, T)            input block (VMEM)
    # w_ref: (out_dim*C*kernel_size,)   flattened conv weight, scalars in SMEM
    # o_ref: (block_n*out_dim, T)       softmax(conv1d(x), time) block (VMEM)
    nb, num_ch, t_len = x_ref.shape
    pad = kernel_size // 2

    # Per-channel rows, cast to f32 once and reused across all taps / output channels.
    # (For large feature_dim, replace this unrolled VPU loop with one MXU contraction
    # whose free dimension is block_n*T.)
    xc = [x_ref[:, c, :].astype(jnp.float32) for c in range(num_ch)]

    for o in range(out_dim):
        acc = jnp.zeros((nb, t_len), jnp.float32)
        for k in range(kernel_size):
            # Channel reduction on the VPU: z[n, t] = sum_c w[o, c, k] * x[n, c, t].
            z = w_ref[(o * num_ch) * kernel_size + k] * xc[0]
            for c in range(1, num_ch):
                z = z + w_ref[(o * num_ch + c) * kernel_size + k] * xc[c]
            # Conv tap k reads x-time index t + k - pad  ->  shift z by (pad - k).
            acc = acc + _time_shift(z, pad - k)
        # NOTE: conv bias intentionally omitted; softmax over t is invariant to it.

        # Numerically-stable softmax over the time axis on a dense (nb, T) slab (f32).
        m = jnp.max(acc, axis=-1, keepdims=True)
        e = jnp.exp(acc - m)
        s = jnp.sum(e, axis=-1, keepdims=True)
        inv = pl.reciprocal(s, approx=True)      # EUP slot (no VALU divide)
        inv = inv * (2.0 - s * inv)              # one Newton step -> ~f32 accuracy
        res = (e * inv).astype(o_ref.dtype)

        if out_dim == 1:
            o_ref[...] = res
        else:
            # Rows of the (block_n*O, T) block are batch-major / o-minor.
            o_ref[pl.ds(o, nb, stride=out_dim), :] = res


def _vmem_budget():
    """(per-step block budget, vmem_limit_bytes), sized per TPU generation."""
    try:
        cap = pltpu.get_tpu_info().vmem_capacity_bytes
    except Exception:
        cap = 0
    if cap >= 100 * 1024 * 1024:       # v5e / v6e class: 128 MiB physical VMEM
        return 20 * 1024 * 1024, 64 * 1024 * 1024
    # v7x class (64 MiB per TensorCore) or unknown: stay conservative.
    return 10 * 1024 * 1024, 32 * 1024 * 1024


def _pick_block_n(N, C, T, O, K, itemsize, budget_bytes):
    """Batch elements per grid step (ragged last block allowed)."""
    # Double-buffered input block + f32 channel rows, plus double-buffered output block
    # and the per-tap / softmax f32 temporaries.
    per_n = ((2 * itemsize + 8) * C * T
             + (2 * itemsize + (2 * K + 6) * 4) * O * T)
    nb = max(1, min(N, int(budget_bytes // max(per_n, 1))))

    # Enough grid steps for DMA/compute overlap and for dual-TensorCore parts to split
    # the (parallel) batch axis -- only when N is large enough to allow it.
    min_steps = 4
    if nb * min_steps > N:
        nb = max(1, -(-N // min_steps))

    # The (block_n*O, T) output tile's sublane dim must be a multiple of 8 unless the
    # block covers the whole batch (TPU (8,128) tiling rule).
    unit = 8 // math.gcd(O, 8)
    if nb < N:
        nb = (nb // unit) * unit if nb >= unit else min(N, unit)
    if nb >= N:
        return int(N)

    # Best effort: even number of grid steps so both TCs on dual-core chips get equal work.
    steps = -(-N // nb)
    if steps % 2 and nb > unit and (-(-N // (nb - unit))) % 2 == 0:
        nb -= unit
    return int(nb)


def temporal_attention(x, weight, bias=None, *, block_n=None):
    """softmax(Conv1d(x; weight, bias), dim=2).

    x: (N, C, T), weight: (O, C, K), bias: (O,) or None.  The bias is ignored because
    softmax over the time axis is invariant to a per-(n, o) constant.  Returns (N, O, T).
    """
    N, C, T = x.shape
    O, C_w, K = weight.shape
    assert C_w == C, (C_w, C)
    del bias  # mathematical no-op under the time-axis softmax

    w_flat = weight.reshape(-1).astype(jnp.float32)      # (O*C*K,) scalars -> SMEM

    budget, vmem_limit = _vmem_budget()
    if block_n is None:
        block_n = _pick_block_n(N, C, T, O, K, jnp.dtype(x.dtype).itemsize, budget)
    else:
        block_n = max(1, min(int(block_n), N))
        unit = 8 // math.gcd(O, 8)
        if block_n < N and block_n % unit:
            block_n = min(N, max(unit, (block_n // unit) * unit))
    grid = pl.cdiv(N, block_n)

    out2d = pl.pallas_call(
        functools.partial(temporal_attention_kernel, out_dim=O, kernel_size=K),
        out_shape=jax.ShapeDtypeStruct((N * O, T), x.dtype),
        grid_spec=pltpu.PrefetchScalarGridSpec(
            num_scalar_prefetch=0,
            grid=(grid,),
            in_specs=[
                pl.BlockSpec((block_n, C, T), lambda n: (n, 0, 0)),   # input block
                pl.BlockSpec(memory_space=pltpu.MemorySpace.SMEM),    # weight scalars
            ],
            out_specs=pl.BlockSpec((block_n * O, T), lambda n: (n, 0)),
        ),
        compiler_params=pltpu.CompilerParams(
            dimension_semantics=("parallel",),
            vmem_limit_bytes=vmem_limit,
        ),
    )(x, w_flat)
    return out2d.reshape(N, O, T)


def _reference(x, weight, bias):
    """Pure-JAX reference of Conv1d(padding=K//2) + softmax(dim=2), bias included."""
    N, C, T = x.shape
    O, _, K = weight.shape
    pad = K // 2
    x_pad = jnp.pad(x, ((0, 0), (0, 0), (pad, pad)))
    out = jnp.zeros((N, O, T), jnp.float32) + bias.reshape(1, O, 1)
    for k in range(K):
        out = out + jnp.einsum("nct,oc->not", x_pad[:, :, k:k + T], weight[:, :, k])
    return jax.nn.softmax(out, axis=2)


if __name__ == "__main__":
    key = jax.random.PRNGKey(0)
    k_x, k_w, k_b = jax.random.split(key, 3)

    # Small shapes consistent with the module defaults: batch=4, feature_dim=4,
    # seq_len=16, output_dim=1, kernel_size=3.
    N, C, T = 4, 4, 16
    O, K = 1, 3

    x = jax.random.normal(k_x, (N, C, T), dtype=jnp.float32)

    # Deterministic parameter init mimicking nn.Conv1d default (uniform +-1/sqrt(C*K)).
    bound = 1.0 / math.sqrt(C * K)
    weight = jax.random.uniform(k_w, (O, C, K), jnp.float32, -bound, bound)
    bias = jax.random.uniform(k_b, (O,), jnp.float32, -bound, bound)

    out = jax.block_until_ready(temporal_attention(x, weight, bias))
    ref = _reference(x, weight, bias)

    assert out.shape == (N, O, T)
    assert jnp.allclose(out, ref, atol=1e-4, rtol=1e-4), "mismatch vs reference"
    # softmax over time should sum to 1
    assert jnp.allclose(jnp.sum(out, axis=2), 1.0, atol=1e-4)

    print("KERNEL_OK")
</pallas_src>

<mosaic_0001>
module attributes {stable_mosaic.version = 11 : i64} {
  func.func @temporal_attention_kernel(%arg0: i32, %arg1: memref<4x4x16xf32, #tpu.memory_space<vmem>>, %arg2: memref<12xf32, #tpu.memory_space<smem>>, %arg3: memref<4x16xf32, #tpu.memory_space<vmem>>) attributes {dimension_semantics = [#tpu.dimension_semantics<parallel>], iteration_bounds = array<i64: 1>, scalar_prefetch = 0 : i64, scratch_operands = 0 : i64, tpu.core_type = #tpu.core_type<tc>, window_params = [{transform_indices = @transform_0, window_bounds = array<i64: 4, 4, 16>}, {transform_indices = @transform_1, window_bounds = array<i64: 12>}, {transform_indices = @transform_2, window_bounds = array<i64: 4, 16>}]} {
    %c0 = arith.constant 0 : index
    %c0_0 = arith.constant 0 : index
    %c0_1 = arith.constant 0 : index
    %0 = vector.load %arg1[%c0, %c0_0, %c0_1] : memref<4x4x16xf32, #tpu.memory_space<vmem>>, vector<4x1x16xf32>
    %1 = vector.shape_cast %0 : vector<4x1x16xf32> to vector<4x16xf32>
    %c0_2 = arith.constant 0 : index
    %c1 = arith.constant 1 : index
    %c0_3 = arith.constant 0 : index
    %2 = vector.load %arg1[%c0_2, %c1, %c0_3] : memref<4x4x16xf32, #tpu.memory_space<vmem>>, vector<4x1x16xf32>
    %3 = vector.shape_cast %2 : vector<4x1x16xf32> to vector<4x16xf32>
    %c0_4 = arith.constant 0 : index
    %c2 = arith.constant 2 : index
    %c0_5 = arith.constant 0 : index
    %4 = vector.load %arg1[%c0_4, %c2, %c0_5] : memref<4x4x16xf32, #tpu.memory_space<vmem>>, vector<4x1x16xf32>
    %5 = vector.shape_cast %4 : vector<4x1x16xf32> to vector<4x16xf32>
    %c0_6 = arith.constant 0 : index
    %c3 = arith.constant 3 : index
    %c0_7 = arith.constant 0 : index
    %6 = vector.load %arg1[%c0_6, %c3, %c0_7] : memref<4x4x16xf32, #tpu.memory_space<vmem>>, vector<4x1x16xf32>
    %7 = vector.shape_cast %6 : vector<4x1x16xf32> to vector<4x16xf32>
    %cst = arith.constant 0.000000e+00 : f32
    %8 = vector.broadcast %cst : f32 to vector<4x16xf32>
    %c0_8 = arith.constant 0 : index
    %9 = memref.load %arg2[%c0_8] : memref<12xf32, #tpu.memory_space<smem>>
    %10 = vector.broadcast %9 : f32 to vector<4x16xf32>
    %11 = arith.mulf %10, %1 : vector<4x16xf32>
    %c3_9 = arith.constant 3 : index
    %12 = memref.load %arg2[%c3_9] : memref<12xf32, #tpu.memory_space<smem>>
    %13 = vector.broadcast %12 : f32 to vector<4x16xf32>
    %14 = arith.mulf %13, %3 : vector<4x16xf32>
    %15 = arith.addf %11, %14 : vector<4x16xf32>
    %c6 = arith.constant 6 : index
    %16 = memref.load %arg2[%c6] : memref<12xf32, #tpu.memory_space<smem>>
    %17 = vector.broadcast %16 : f32 to vector<4x16xf32>
    %18 = arith.mulf %17, %5 : vector<4x16xf32>
    %19 = arith.addf %15, %18 : vector<4x16xf32>
    %c9 = arith.constant 9 : index
    %20 = memref.load %arg2[%c9] : memref<12xf32, #tpu.memory_space<smem>>
    %21 = vector.broadcast %20 : f32 to vector<4x16xf32>
    %22 = arith.mulf %21, %7 : vector<4x16xf32>
    %23 = arith.addf %19, %22 : vector<4x16xf32>
    %cst_10 = arith.constant 0.000000e+00 : f32
    %24 = vector.broadcast %cst_10 : f32 to vector<4x1xf32>
    %25 = vector.extract_strided_slice %23 {offsets = [0, 0], sizes = [4, 15], strides = [1, 1]} : vector<4x16xf32> to vector<4x15xf32>
    %26 = tpu.concatenate %24, %25 in 1 : vector<4x1xf32>, vector<4x15xf32> -> vector<4x16xf32>
    %27 = arith.addf %8, %26 : vector<4x16xf32>
    %c1_11 = arith.constant 1 : index
    %28 = memref.load %arg2[%c1_11] : memref<12xf32, #tpu.memory_space<smem>>
    %29 = vector.broadcast %28 : f32 to vector<4x16xf32>
    %30 = arith.mulf %29, %1 : vector<4x16xf32>
    %c4 = arith.constant 4 : index
    %31 = memref.load %arg2[%c4] : memref<12xf32, #tpu.memory_space<smem>>
    %32 = vector.broadcast %31 : f32 to vector<4x16xf32>
    %33 = arith.mulf %32, %3 : vector<4x16xf32>
    %34 = arith.addf %30, %33 : vector<4x16xf32>
    %c7 = arith.constant 7 : index
    %35 = memref.load %arg2[%c7] : memref<12xf32, #tpu.memory_space<smem>>
    %36 = vector.broadcast %35 : f32 to vector<4x16xf32>
    %37 = arith.mulf %36, %5 : vector<4x16xf32>
    %38 = arith.addf %34, %37 : vector<4x16xf32>
    %c10 = arith.constant 10 : index
    %39 = memref.load %arg2[%c10] : memref<12xf32, #tpu.memory_space<smem>>
    %40 = vector.broadcast %39 : f32 to vector<4x16xf32>
    %41 = arith.mulf %40, %7 : vector<4x16xf32>
    %42 = arith.addf %38, %41 : vector<4x16xf32>
    %43 = arith.addf %27, %42 : vector<4x16xf32>
    %c2_12 = arith.constant 2 : index
    %44 = memref.load %arg2[%c2_12] : memref<12xf32, #tpu.memory_space<smem>>
    %45 = vector.broadcast %44 : f32 to vector<4x16xf32>
    %46 = arith.mulf %45, %1 : vector<4x16xf32>
    %c5 = arith.constant 5 : index
    %47 = memref.load %arg2[%c5] : memref<12xf32, #tpu.memory_space<smem>>
    %48 = vector.broadcast %47 : f32 to vector<4x16xf32>
    %49 = arith.mulf %48, %3 : vector<4x16xf32>
    %50 = arith.addf %46, %49 : vector<4x16xf32>
    %c8 = arith.constant 8 : index
    %51 = memref.load %arg2[%c8] : memref<12xf32, #tpu.memory_space<smem>>
    %52 = vector.broadcast %51 : f32 to vector<4x16xf32>
    %53 = arith.mulf %52, %5 : vector<4x16xf32>
    %54 = arith.addf %50, %53 : vector<4x16xf32>
    %c11 = arith.constant 11 : index
    %55 = memref.load %arg2[%c11] : memref<12xf32, #tpu.memory_space<smem>>
    %56 = vector.broadcast %55 : f32 to vector<4x16xf32>
    %57 = arith.mulf %56, %7 : vector<4x16xf32>
    %58 = arith.addf %54, %57 : vector<4x16xf32>
    %cst_13 = arith.constant 0.000000e+00 : f32
    %59 = vector.broadcast %cst_13 : f32 to vector<4x1xf32>
    %60 = vector.extract_strided_slice %58 {offsets = [0, 1], sizes = [4, 15], strides = [1, 1]} : vector<4x16xf32> to vector<4x15xf32>
    %61 = tpu.concatenate %60, %59 in 1 : vector<4x15xf32>, vector<4x1xf32> -> vector<4x16xf32>
    %62 = arith.addf %43, %61 : vector<4x16xf32>
    %cst_14 = arith.constant dense<0xFF800000> : vector<4xf32>
    %63 = vector.multi_reduction <maximumf>, %62, %cst_14 [1] : vector<4x16xf32> to vector<4xf32>
    %64 = vector.shape_cast %63 : vector<4xf32> to vector<4x1xf32>
    %65 = vector.broadcast %64 : vector<4x1xf32> to vector<4x16xf32>
    %66 = arith.subf %62, %65 : vector<4x16xf32>
    %67 = math.exp %66 : vector<4x16xf32>
    %cst_15 = arith.constant dense<0.000000e+00> : vector<4xf32>
    %68 = vector.multi_reduction <add>, %67, %cst_15 [1] : vector<4x16xf32> to vector<4xf32>
    %69 = vector.shape_cast %68 : vector<4xf32> to vector<4x1xf32>
    %70 = tpu.reciprocal %69 {approx = true} : vector<4x1xf32> -> vector<4x1xf32>
    %71 = arith.mulf %69, %70 : vector<4x1xf32>
    %cst_16 = arith.constant 2.000000e+00 : f32
    %72 = vector.broadcast %cst_16 : f32 to vector<4x1xf32>
    %73 = arith.subf %72, %71 : vector<4x1xf32>
    %74 = arith.mulf %70, %73 : vector<4x1xf32>
    %75 = vector.broadcast %74 : vector<4x1xf32> to vector<4x16xf32>
    %76 = arith.mulf %67, %75 : vector<4x16xf32>
    %c0_17 = arith.constant 0 : index
    %c0_18 = arith.constant 0 : index
    %77 = vector.load %arg3[%c0_17, %c0_18] : memref<4x16xf32, #tpu.memory_space<vmem>>, vector<4x16xf32>
    tpu.vector_store %arg3[%c0_17, %c0_18], %76 {strides = array<i32>} : memref<4x16xf32, #tpu.memory_space<vmem>>, vector<4x16xf32>,
    return
  }
  func.func @transform_0(%arg0: i32) -> (i32, i32, i32) {
    %c0_i32 = arith.constant 0 : i32
    %c0_i32_0 = arith.constant 0 : i32
    %c0_i32_1 = arith.constant 0 : i32
    return %arg0, %c0_i32, %c0_i32_0 : i32, i32, i32
  }
  func.func @transform_1(%arg0: i32) -> i32 {
    %c0_i32 = arith.constant 0 : i32
    %c0_i32_0 = arith.constant 0 : i32
    return %c0_i32 : i32
  }
  func.func @transform_2(%arg0: i32) -> (i32, i32) {
    %c0_i32 = arith.constant 0 : i32
    %c0_i32_0 = arith.constant 0 : i32
    return %arg0, %c0_i32 : i32, i32
  }
}

</mosaic_0001>

<bundles_post_ra>
// kernel: tpu_custom_call.1
= control target key start
LH: loop header
LB: loop body
LE: loop exit
PB: predicated region body
PF: predicated region fallthrough
CT: control target
= control target key end

     0   :  { %7 = vsyncpa [#allocation3], 0  ;;  %s472_s0 = inlined_call_operand.hbm [shape: f32[4,4,16], index: 0, kind: input, shape index: {}]   ;;  %s473_s1 = inlined_call_operand.vmem [shape: f32[12], index: 1, kind: input, shape index: {}]   ;;  %s474_s2 = inlined_call_operand.hbm [shape: f32[4,16], index: 2, kind: output, shape index: {}]  }
   0x1   :  { %8 = vsyncpa [#allocation5], 0 }
   0x2   :  { %9 = vsyncpa [#allocation4], 0  ;;  %s322_s9 = smov [#allocation2]   ;;  %s28_s13 = sshll.u32 %s473_s1, 4  ;;  %s29_s13 = int_to_ptr.vmem [resolvable:$true] %s28_s13 }
   0x3   :  { %s15_s10 = sshll.u32 %s322_s9, 4  ;;  %s16_s10 = int_to_ptr.vmem [resolvable:$true] %s15_s10 }
   0x4   :  { %s272_s14 = scalar_lea.vmem %s16_s10, 256  ;;  %p277_p1 = scmp.lt.s32.totalorder %s16_s10, %s16_s10 }
   0x5   :  { %p273_p0 = scmp.ne.s32.totalorder %s16_s10, %s272_s14  ;;  %p278_p2 = scmp.lt.s32.totalorder %s272_s14, %s272_s14 }
   0x7   :  { %p279_p3 = por %p278_p2, %p277_p1 }
   0x9   :  { %p280_p4 = pnand %p279_p3, %p273_p0 }
   0xb   :  { %283 = shalt.err (!%p280_p4)
}
   0xc   :  { %s323_s15 = smov 64   ;;  %s324_s16 = smov 4  }
   0xd   :  { %21 = dma.hbm_to_vmem [thread:$0]  %s472_s0, 256, %s16_s10, [#allocation3], %s323_s15, %s323_s15, %s324_s16  }
   0xe   :  { %s284_s19 = scalar_lea.vmem %s29_s13, 16  ;;  %p289_p6 = scmp.lt.s32.totalorder %s29_s13, %s29_s13 }
   0xf   :  { %p285_p5 = scmp.ne.s32.totalorder %s29_s13, %s284_s19  ;;  %p290_p7 = scmp.lt.s32.totalorder %s284_s19, %s284_s19 }
  0x11   :  { %p291_p8 = por %p290_p7, %p289_p6 }
  0x13   :  { %p292_p9 = pnand %p291_p8, %p285_p5 }
  0x15   :  { %295 = shalt.err (!%p292_p9)
}
  0x16   :  { %s325_s1 = smov [#allocation6]  }
  0x17   :  { %31 = dma.vmem_to_smem %s29_s13, 16, %s325_s1, [#allocation5]  }
  0x18   :  { %316 = dma.done.wait [#allocation3], 256  }
  0x19   :  { %317 = vsyncadd [#allocation3], 4294967040 }
  0x1a   :  { %318 = dma.done.wait [#allocation5], 16  }
  0x1b   :  { %319 = vsyncadd [#allocation5], 4294967280 }
  0x1c   :  { %38 = sfence }
  0x1d   :  { %s55_s20 = sld [smem:[#allocation6]]  ;;  %v350_v0 = vld [vmem:[#allocation2] sm:$0x1]  ;;  %v352_v1 = vld [vmem:[#allocation2 + $0x4] sm:$0x1]  ;;  %vm96_vm0 = vcmask 1041409  }
  0x1e   :  { %s242_s21 = sld [smem:[#allocation6 + $0x3]]  ;;  %v354_v2 = vld [vmem:[#allocation2 + $0x8] sm:$0x1]  ;;  %v358_v3 = vld [vmem:[#allocation2 + $0xc] sm:$0x1]  ;;  %vm99_vm1 = vcmask 1042434  }
  0x1f   :  { %s243_s0 = sld [smem:[#allocation6 + $0x6]]  ;;  %v360_v4 = vld [vmem:[#allocation2 + $0x1] sm:$0x1]  ;;  %v364_v5 = vld [vmem:[#allocation2 + $0x5] sm:$0x1]  ;;  %vm102_vm2 = vcmask 1043459  }
  0x20   :  { %s356_s22 = sld [smem:[#allocation6 + $0x9]]  ;;  %v366_v6 = vld [vmem:[#allocation2 + $0x9] sm:$0x1]  ;;  %v370_v7 = vld [vmem:[#allocation2 + $0xd] sm:$0x1]  ;;  %s326_s3 = smov 1  }
  0x21   :  { %s362_s23 = sld [smem:[#allocation6 + $0x2]]  ;;  %v372_v8 = vld [vmem:[#allocation2 + $0x2] sm:$0x1]  ;;  %v376_v10 = vld [vmem:[#allocation2 + $0x6] sm:$0x1]  ;;  %s327_s4 = smov 127  }
  0x22   :  { %s368_s24 = sld [smem:[#allocation6 + $0x5]]  ;;  %v378_v11 = vld [vmem:[#allocation2 + $0xa] sm:$0x1]  ;;  %v380_v12 = vld [vmem:[#allocation2 + $0xe] sm:$0x1]  ;;  %vm107_vm3 = vcmask 7168  }
  0x23   :  { %v56_v9 = vstv %s55_s20  ;;  %s374_s25 = sld [smem:[#allocation6 + $0x8]]  ;;  %v390_v23 = vld [vmem:[#allocation2 + $0x3] sm:$0x1]  ;;  %v396_v28 = vld [vmem:[#allocation2 + $0x7] sm:$0x1]  ;;  %vm207_vm4 = vcmask 121856  }
  0x24   :  { %v57_v13 = vmul.f32 %v56_v9, %v350_v0  ;;  %v58_v14 = vmul.f32 %v56_v9, %v352_v1  ;;  %v59_v15 = vmul.f32 %v56_v9, %v354_v2  ;;  %v60_v16 = vmul.f32 %v56_v9, %v358_v3  ;;  %v398_v29 = vld [vmem:[#allocation2 + $0xb] sm:$0x1]  ;;  %v400_v30 = vld [vmem:[#allocation2 + $0xf] sm:$0x1]  ;;  %s406_s26 = sld [smem:[#allocation6 + $0xb]]  ;;  %s328_s5 = smov [#allocation7]  }
  0x25   :  { %v62_v17 = vstv %s242_s21  ;;  %v72_v18 = vstv %s243_s0  ;;  %s408_s27 = sld [smem:[#allocation6 + $0x1]]  ;;  %vm210_vm5 = vcmask 125952   ;;  %s232_s6 = sshll.u32 %s328_s5, 4  ;;  %s233_s6 = int_to_ptr.vmem [resolvable:$true] %s232_s6 }
  0x26   :  { %v63_v19 = vmul.f32 %v62_v17, %v360_v4  ;;  %v64_v20 = vmul.f32 %v62_v17, %v364_v5  ;;  %v65_v21 = vmul.f32 %v62_v17, %v366_v6  ;;  %v66_v22 = vmul.f32 %v62_v17, %v370_v7  ;;  %s418_s28 = sld [smem:[#allocation6 + $0x4]]  ;;  %s296_s7 = scalar_lea.vmem %s233_s6, 64 }
  0x27   :  { %v73_v24 = vmul.f32 %v72_v18, %v372_v8  ;;  %v74_v25 = vmul.f32 %v72_v18, %v376_v10  ;;  %v75_v26 = vmul.f32 %v72_v18, %v378_v11  ;;  %v76_v27 = vmul.f32 %v72_v18, %v380_v12  ;;  %s424_s29 = sld [smem:[#allocation6 + $0x7]]  ;;  %p297_p10 = scmp.ne.s32.totalorder %s233_s6, %s296_s7 }
  0x28   :  { %v67_v31 = vadd.f32 %v63_v19, %v57_v13  ;;  %v68_v32 = vadd.f32 %v64_v20, %v58_v14  ;;  %v69_v33 = vadd.f32 %v65_v21, %v59_v15  ;;  %v70_v34 = vadd.f32 %v66_v22, %v60_v16  ;;  %s427_s30 = sld [smem:[#allocation6 + $0xa]]  ;;  %p301_p11 = scmp.lt.s32.totalorder %s233_s6, %s233_s6 }
  0x29   :  { %v82_v35 = vstv %s356_s22  ;;  %v159_v36 = vstv %s362_s23  ;;  %v165_v37 = vstv %s368_s24  ;;  %v175_v38 = vstv %s374_s25  ;;  %p302_p12 = scmp.lt.s32.totalorder %s296_s7, %s296_s7 }
  0x2a   :  { %v77_v39 = vadd.f32 %v73_v24, %v67_v31  ;;  %v78_v40 = vadd.f32 %v74_v25, %v68_v32  ;;  %v79_v41 = vadd.f32 %v75_v26, %v69_v33  ;;  %v80_v42 = vadd.f32 %v76_v27, %v70_v34 }
  0x2b   :  { %v83_v43 = vmul.f32 %v82_v35, %v390_v23  ;;  %v84_v44 = vmul.f32 %v82_v35, %v396_v28  ;;  %v85_v45 = vmul.f32 %v82_v35, %v398_v29  ;;  %v86_v46 = vmul.f32 %v82_v35, %v400_v30  ;;  %p303_p13 = por %p302_p12, %p301_p11 }
  0x2c   :  { %v160_v47 = vmul.f32 %v159_v36, %v350_v0  ;;  %v161_v48 = vmul.f32 %v159_v36, %v352_v1  ;;  %v162_v49 = vmul.f32 %v159_v36, %v354_v2  ;;  %v163_v50 = vmul.f32 %v159_v36, %v358_v3 }
  0x2d   :  { %v87_v51 = vadd.f32 %v83_v43, %v77_v39  ;;  %v88_v52 = vadd.f32 %v84_v44, %v78_v40  ;;  %v89_v53 = vadd.f32 %v85_v45, %v79_v41  ;;  %v90_v54 = vadd.f32 %v86_v46, %v80_v42  ;;  %p304_p0 = pnand %p303_p13, %p297_p10 }
  0x2e   :  { %v166_v55 = vmul.f32 %v165_v37, %v360_v4  ;;  %v167_v56 = vmul.f32 %v165_v37, %v364_v5  ;;  %v168_v57 = vmul.f32 %v165_v37, %v366_v6  ;;  %v169_v58 = vmul.f32 %v165_v37, %v370_v7 }
  0x2f   :  { %v95_v59 = vrot.slane %v88_v52, 7  ;;  %v98_v60 = vrot.slane %v89_v53, 6  ;;  %v101_v61 = vrot.slane %v90_v54, 5  ;;  %v176_v62 = vmul.f32 %v175_v38, %v372_v8 }
  0x30   :  { %v170_v63 = vadd.f32 %v166_v55, %v160_v47  ;;  %v171_v9 = vadd.f32 %v167_v56, %v161_v48  ;;  %v172_v13 = vadd.f32 %v168_v57, %v162_v49  ;;  %v173_v14 = vadd.f32 %v169_v58, %v163_v50 }
  0x31   :  { %v97_v15 = vsel %vm96_vm0, %v95_v59, %v87_v51  ;;  %v177_v16 = vmul.f32 %v175_v38, %v376_v10  ;;  %v178_v17 = vmul.f32 %v175_v38, %v378_v11  ;;  %v179_v18 = vmul.f32 %v175_v38, %v380_v12 }
  0x32   :  { %v100_v19 = vsel %vm99_vm1, %v98_v60, %v97_v15  ;;  %v180_v20 = vadd.f32 %v176_v62, %v170_v63  ;;  %v185_v21 = vstv %s406_s26  ;;  %v111_v22 = vstv %s408_s27 }
  0x33   :  { %v103_v24 = vsel %vm102_vm2, %v101_v61, %v100_v19  ;;  %v181_v25 = vadd.f32 %v177_v16, %v171_v9  ;;  %v182_v26 = vadd.f32 %v178_v17, %v172_v13  ;;  %v183_v27 = vadd.f32 %v179_v18, %v173_v14 }
  0x34   :  { %104 = vrot.lane.b32.xlu0 %v103_v24, %s326_s3  ;;  %v186_v31 = vmul.f32 %v185_v21, %v390_v23  ;;  %v187_v32 = vmul.f32 %v185_v21, %v396_v28  ;;  %v188_v33 = vmul.f32 %v185_v21, %v398_v29  ;;  %v189_v34 = vmul.f32 %v185_v21, %v400_v30 }
  0x35   :  { %v112_v35 = vmul.f32 %v111_v22, %v350_v0  ;;  %v113_v36 = vmul.f32 %v111_v22, %v352_v1  ;;  %v114_v37 = vmul.f32 %v111_v22, %v354_v2  ;;  %v115_v42 = vmul.f32 %v111_v22, %v358_v3 }
  0x36   :  { %v190_v38 = vadd.f32 %v186_v31, %v180_v20  ;;  %v191_v39 = vadd.f32 %v187_v32, %v181_v25  ;;  %v192_v40 = vadd.f32 %v188_v33, %v182_v26  ;;  %v193_v41 = vadd.f32 %v189_v34, %v183_v27 }
  0x37   :  { %v117_v43 = vstv %s418_s28  ;;  %v127_v44 = vstv %s424_s29  ;;  %v137_v45 = vstv %s427_s30 }
  0x38   :  { %v198_v46 = vrot.slane %v191_v39, 7  ;;  %v200_v47 = vrot.slane %v192_v40, 6  ;;  %v202_v48 = vrot.slane %v193_v41, 5  ;;  %v118_v49 = vmul.f32 %v117_v43, %v360_v4 }
  0x39   :  { %v119_v0 = vmul.f32 %v117_v43, %v364_v5  ;;  %v120_v1 = vmul.f32 %v117_v43, %v366_v6  ;;  %v121_v2 = vmul.f32 %v117_v43, %v370_v7  ;;  %v128_v50 = vmul.f32 %v127_v44, %v372_v8 }
  0x3a   :  { %v199_v51 = vsel %vm96_vm0, %v198_v46, %v190_v38  ;;  %v122_v52 = vadd.f32 %v118_v49, %v112_v35  ;;  %v129_v3 = vmul.f32 %v127_v44, %v376_v10  ;;  %v130_v53 = vmul.f32 %v127_v44, %v378_v11 }
  0x3b   :  { %v201_v54 = vsel %vm99_vm1, %v200_v47, %v199_v51  ;;  %v123_v55 = vadd.f32 %v119_v0, %v113_v36  ;;  %v124_v56 = vadd.f32 %v120_v1, %v114_v37  ;;  %v125_v4 = vadd.f32 %v121_v2, %v115_v42 }
  0x3c   :  { %v203_v5 = vsel %vm102_vm2, %v202_v48, %v201_v54  ;;  %v131_v6 = vmul.f32 %v127_v44, %v380_v12  ;;  %v132_v57 = vadd.f32 %v128_v50, %v122_v52  ;;  %v138_v7 = vmul.f32 %v137_v45, %v390_v23 }
  0x3d   :  { %204 = vrot.lane.b32.xlu0 %v203_v5, %s327_s4  ;;  %v133_v8 = vadd.f32 %v129_v3, %v123_v55  ;;  %v134_v58 = vadd.f32 %v130_v53, %v124_v56  ;;  %v139_v10 = vmul.f32 %v137_v45, %v396_v28  ;;  %v140_v11 = vmul.f32 %v137_v45, %v398_v29 }
  0x3e   :  { %v135_v59 = vadd.f32 %v131_v6, %v125_v4  ;;  %v141_v60 = vmul.f32 %v137_v45, %v400_v30  ;;  %v142_v61 = vadd.f32 %v138_v7, %v132_v57 }
  0x3f   :  { %v143_v62 = vadd.f32 %v139_v10, %v133_v8  ;;  %v144_v63 = vadd.f32 %v140_v11, %v134_v58 }
  0x40   :  { %v145_v9 = vadd.f32 %v141_v60, %v135_v59 }
  0x41   :  { %v150_v13 = vrot.slane %v143_v62, 7  ;;  %v152_v12 = vrot.slane %v144_v63, 6 }
  0x42   :  { %v154_v14 = vrot.slane %v145_v9, 5 }
  0x43   :  { %v151_v23 = vsel %vm96_vm0, %v150_v13, %v142_v61 }
  0x44   :  { %v153_v15 = vsel %vm99_vm1, %v152_v12, %v151_v23 }
  0x45   :  { %v155_v16 = vsel %vm102_vm2, %v154_v14, %v153_v15 }
  0xa6   :  { %v105_v28 = vpop.permute.xlu0 %104 }
  0xa7   :  { %v108_v17 = vsel %vm107_vm3, 0.0, %v105_v28 }
  0xa8   :  { %v157_v29 = vadd.f32 %v155_v16, %v108_v17 }
  0xaf   :  { %v205_v18 = vpop.permute.xlu0 %204 }
  0xb0   :  { %v208_v30 = vsel %vm207_vm4, %v205_v18, 0.0 }
  0xb1   :  { %v209_v19 = vadd.f32 %v208_v30, %v157_v29 }
  0xb3   :  { %v211_v20 = vsel %vm210_vm5, %v209_v19, -inf }
  0xb4   :  { %212 = vmax.xlane.f32.xlu1 %v211_v20 }
 0x13d   :  { %v213_v21 = vpop.xlane.xlu1 %212 }
 0x13e   :  { %v214_v22 = vsub.f32 %v209_v19, %v213_v21 }
 0x140   :  { %v215_v24 = vmul.f32 1.442695, %v214_v22 }
 0x142   :  { %260 = vpow2.f32 %v215_v24 }
 0x14f   :  { %v261_v25 = vpop.eup %260 }
 0x150   :  { %v217_v26 = vsel %vm210_vm5, %v261_v25, 0.0 }
 0x151   :  { %218 = vadd.xlane.f32.xlu1 %v217_v26 }
 0x1da   :  { %v219_v27 = vpop.xlane.xlu1 %218 }
 0x1db   :  { %262 = vrcp.f32 %v219_v27 }
 0x1e8   :  { %v263_v31 = vpop.eup %262 }
 0x1e9   :  { %v221_v32 = vmul.f32 %v263_v31, %v219_v27 }
 0x1eb   :  { %v222_v33 = vsub.f32 2.0, %v221_v32 }
 0x1ed   :  { %v223_v34 = vmul.f32 %v263_v31, %v222_v33 }
 0x1ef   :  { %v224_v35 = vmul.f32 %v261_v25, %v223_v34 }
 0x1f1   :  { %225 = vst.msk [vmem:[#allocation7] sm:$0xf] %vm210_vm5, %v224_v35 }
 0x1f2   :  { %307 = shalt.err (!%p304_p0)
}
 0x1f3   :  { %235 = dma.vmem_to_hbm [thread:$0]  %s233_s6, 64, %s474_s2, [#allocation4]  }
 0x1f4   :  { %320 = dma.done.wait [#allocation4], 64  }
 0x1f5   :  { %321 = vsyncadd [#allocation4], 4294967232 }
 0x1f6   :  { %239 = vsyncpa [#allocation3], 1 }
 0x1f7   :  { %240 = vsyncpa [#allocation4], 1 }
 0x1f8   :  { %241 = vsyncpa [#allocation5], 1 }

</bundles_post_ra>
